<compile_context>
chip_gen: v6e
topology: v6e:2x2x1
jax: 0.10.0
libtpu: 0.0.40
codegen_flags: <defaults>
</compile_context>

<pallas_src>
import jax
import jax.numpy as jnp
from jax.experimental import pallas as pl
from jax.experimental.pallas import tpu as pltpu


def lstm_tile_kernel(x_ref, bias_ref, wih_hbm, whh_hbm, out_ref,
                     wih_scr, whh_scr, gx_scr, h_scr, c_scr, sems):
    """One grid step == one time tile of the LSTM recurrence.

    x_ref   : (T*B, D)   time-major input rows for this tile (row = t*B + b)
    bias_ref: (1, 4H)    b_ih + b_hh
    wih_hbm : (D, 4H)    W_ih^T, left in place (memory_space=pl.ANY)
    whh_hbm : (H, 4H)    W_hh^T, left in place (memory_space=pl.ANY)
    out_ref : (T*B, H)   hidden states for this tile (row = t*B + b)
    wih_scr : (D, 4H)    single-buffered VMEM copy of W_ih^T (persists across tiles)
    whh_scr : (H, 4H)    single-buffered VMEM copy of W_hh^T (persists across tiles)
    gx_scr  : (T*B, 4H)  per-tile input projection (never leaves VMEM)
    h_scr   : (B, H)     hidden state carried across time tiles
    c_scr   : (B, H)     cell state carried across time tiles
    sems    : (2,)       DMA semaphores for the one-shot weight copies
    """
    B, H = h_scr.shape
    H4 = 4 * H
    T = x_ref.shape[0] // B

    @pl.when(pl.program_id(0) == 0)
    def _():
        # One-shot weight DMA (single-buffered residency for the whole grid).
        cp_ih = pltpu.make_async_copy(wih_hbm, wih_scr, sems.at[0])
        cp_hh = pltpu.make_async_copy(whh_hbm, whh_scr, sems.at[1])
        cp_ih.start()
        cp_hh.start()
        cp_ih.wait()
        cp_hh.wait()
        h_scr[...] = jnp.zeros_like(h_scr)
        c_scr[...] = jnp.zeros_like(c_scr)

    # Fused, hoisted input projection for the whole tile: a single MXU GEMM with T*B
    # rows (keep time_block*B >= 128 on v5e / 256 on v6e/v7x at production sizes so
    # the M dimension is filled).  Bias folded in; result stays in VMEM.
    gx_scr[...] = (
        jnp.dot(x_ref[...], wih_scr[...], preferred_element_type=jnp.float32)
        + bias_ref[...]
    )

    whh = whh_scr[...]  # loop-invariant load

    # sigmoid(z) = 0.5*(1 + tanh(z/2)): pre-scale the i/f/o lane blocks by 0.5 so a
    # single tanh over the whole (B, 4H) slab covers all four gates.
    lane = jax.lax.broadcasted_iota(jnp.int32, (B, H4), 1)
    pre_scale = jnp.where((lane >= 2 * H) & (lane < 3 * H),
                          jnp.float32(1.0), jnp.float32(0.5))

    # NOTE: at production sizes keep H a multiple of 128 so the gate slices below are
    # free lane-aligned vreg views (at H=32 they are masked extracts).
    def step(t, carry):
        h, c = carry
        row = pl.multiple_of(t * B, B)
        # Only the recurrent matmul remains on the serial dependency chain.
        gates = gx_scr[pl.ds(row, B), :] + jnp.dot(
            h, whh, preferred_element_type=jnp.float32)        # (B, 4H): i, f, g, o
        th = jnp.tanh(gates * pre_scale)                        # one EUP push, 4 gates
        i_g = 0.5 * (1.0 + th[:, 0 * H:1 * H])
        f_g = 0.5 * (1.0 + th[:, 1 * H:2 * H])
        g_g = th[:, 2 * H:3 * H]
        o_g = 0.5 * (1.0 + th[:, 3 * H:4 * H])
        c_new = f_g * c + i_g * g_g
        h_new = o_g * jnp.tanh(c_new)
        out_ref[pl.ds(row, B), :] = h_new.astype(out_ref.dtype)
        return (h_new, c_new)

    # h/c live in vregs inside the loop; bounded partial unroll keeps LLO scheduler
    # visibility without blowing up code size for long tiles.
    h_fin, c_fin = jax.lax.fori_loop(
        0, T, step, (h_scr[...], c_scr[...]), unroll=min(T, 8))
    h_scr[...] = h_fin
    c_scr[...] = c_fin


def _pick_time_block(S, B, D, H, budget_bytes, cap=None):
    """Largest divisor of S whose per-tile VMEM footprint fits budget_bytes (<= cap)."""
    f32 = 4
    fixed = f32 * ((D + H) * 4 * H        # single-buffered weights
                   + 4 * H                # bias
                   + 2 * B * H)           # h, c
    per_t = f32 * B * (2 * D + 4 * H + 2 * H)   # x (2-buf) + gx scratch + out (2-buf)
    best = 1
    for cand in range(1, S + 1):
        if S % cand != 0:
            continue
        if cap is not None and cand > cap:
            continue
        if fixed + cand * per_t <= budget_bytes:
            best = cand
    return best


def basic_unit_lstm(x, w_ih, w_hh, b_ih, b_hh, *, time_block=None,
                    vmem_limit_bytes=32 * 1024 * 1024):
    """Forward of BasicUnit(unit='lstm') in eval mode (zero initial hidden state).

    x    : (batch, seq, input_dim) float32   [batch_first=True layout]
    w_ih : (4*hid, input_dim); w_hh : (4*hid, hid); b_ih, b_hh : (4*hid,)
    returns: (batch, seq, hid)
    """
    B, S, D = x.shape
    H4 = w_ih.shape[0]
    H = H4 // 4

    # Size the time tile against an explicit VMEM budget (scoped defaults differ per
    # generation: 16 MiB v5e / 32 MiB v6e / 32-of-64 MiB v7x). Never silently use S.
    budget = (2 * vmem_limit_bytes) // 3
    if time_block is None or S % time_block != 0:
        time_block = _pick_time_block(S, B, D, H, budget, cap=time_block)
    num_tiles = S // time_block

    f32 = jnp.float32
    # Time-major 2D slabs (row = t*B + b).  One small HBM pass over x; the previous
    # version instead round-tripped the 4H/D-times-larger (S, B, 4H) gate slab.
    x_tm = jnp.transpose(x.astype(f32), (1, 0, 2)).reshape(S * B, D)
    wih_t = jnp.transpose(w_ih.astype(f32), (1, 0))            # (D, 4H)
    whh_t = jnp.transpose(w_hh.astype(f32), (1, 0))            # (H, 4H)
    bias = (b_ih + b_hh).astype(f32).reshape(1, H4)

    out_tm = pl.pallas_call(
        lstm_tile_kernel,
        out_shape=jax.ShapeDtypeStruct((S * B, H), f32),
        grid_spec=pltpu.PrefetchScalarGridSpec(
            num_scalar_prefetch=0,
            grid=(num_tiles,),
            in_specs=[
                pl.BlockSpec((time_block * B, D), lambda i: (i, 0)),
                pl.BlockSpec((1, H4), lambda i: (0, 0)),
                pl.BlockSpec(memory_space=pl.ANY),    # W_ih^T: DMA'd once in-kernel
                pl.BlockSpec(memory_space=pl.ANY),    # W_hh^T: DMA'd once in-kernel
            ],
            out_specs=pl.BlockSpec((time_block * B, H), lambda i: (i, 0)),
            scratch_shapes=[
                pltpu.VMEM((D, H4), f32),                 # W_ih^T, resident all tiles
                pltpu.VMEM((H, H4), f32),                 # W_hh^T, resident all tiles
                pltpu.VMEM((time_block * B, H4), f32),    # per-tile gate slab (VMEM only)
                pltpu.VMEM((B, H), f32),                  # h carried across tiles
                pltpu.VMEM((B, H), f32),                  # c carried across tiles
                pltpu.SemaphoreType.DMA((2,)),
            ],
        ),
        compiler_params=pltpu.CompilerParams(
            # Recurrence over time -> must run sequentially.
            dimension_semantics=("arbitrary",),
            vmem_limit_bytes=vmem_limit_bytes,
        ),
    )(x_tm, bias, wih_t, whh_t)

    # (S*B, H) -> (S, B, H) is a free reshape; only the small output is transposed.
    return jnp.transpose(out_tm.reshape(S, B, H), (1, 0, 2))


def _lstm_reference(x, w_ih, w_hh, b_ih, b_hh):
    """Pure-JAX reference (same math as torch.nn.LSTM, zero init hidden)."""
    B, S, D = x.shape
    H = w_hh.shape[1]
    bias = b_ih + b_hh

    def step(carry, x_t):
        h, c = carry
        gates = x_t @ w_ih.T + h @ w_hh.T + bias
        i_g = jax.nn.sigmoid(gates[:, 0 * H:1 * H])
        f_g = jax.nn.sigmoid(gates[:, 1 * H:2 * H])
        g_g = jnp.tanh(gates[:, 2 * H:3 * H])
        o_g = jax.nn.sigmoid(gates[:, 3 * H:4 * H])
        c_new = f_g * c + i_g * g_g
        h_new = o_g * jnp.tanh(c_new)
        return (h_new, c_new), h_new

    h0 = jnp.zeros((B, H), jnp.float32)
    c0 = jnp.zeros((B, H), jnp.float32)
    _, hs = jax.lax.scan(step, (h0, c0), jnp.transpose(x, (1, 0, 2)))
    return jnp.transpose(hs, (1, 0, 2))


if __name__ == "__main__":
    key = jax.random.PRNGKey(0)
    batch, seq, input_dim, hid_dim = 2, 8, 32, 32

    k = jax.random.split(key, 5)
    bound = 1.0 / jnp.sqrt(hid_dim)
    x = jax.random.normal(k[0], (batch, seq, input_dim), jnp.float32)
    w_ih = jax.random.uniform(k[1], (4 * hid_dim, input_dim), jnp.float32, -bound, bound)
    w_hh = jax.random.uniform(k[2], (4 * hid_dim, hid_dim), jnp.float32, -bound, bound)
    b_ih = jax.random.uniform(k[3], (4 * hid_dim,), jnp.float32, -bound, bound)
    b_hh = jax.random.uniform(k[4], (4 * hid_dim,), jnp.float32, -bound, bound)

    ref = _lstm_reference(x, w_ih, w_hh, b_ih, b_hh)

    # Whole sequence in one time tile (grid=(1,)).
    out = basic_unit_lstm(x, w_ih, w_hh, b_ih, b_hh)
    out = jax.block_until_ready(out)
    assert out.shape == (batch, seq, hid_dim)
    assert jnp.allclose(out, ref, atol=1e-5, rtol=1e-5)

    # Tiled time axis (grid=(2,)) exercises the h/c scratch carry across grid steps.
    out_tiled = basic_unit_lstm(x, w_ih, w_hh, b_ih, b_hh, time_block=4)
    out_tiled = jax.block_until_ready(out_tiled)
    assert jnp.allclose(out_tiled, ref, atol=1e-5, rtol=1e-5)

    # Non-dividing request: picker falls back to the largest divisor (2 -> grid=(4,)).
    out_odd = basic_unit_lstm(x, w_ih, w_hh, b_ih, b_hh, time_block=3)
    out_odd = jax.block_until_ready(out_odd)
    assert jnp.allclose(out_odd, ref, atol=1e-5, rtol=1e-5)

    # TODO(synk): stateful hidden-state carry across forward() calls, the random 20%
    # hidden reset in training mode, and PackedSequence (x.batch_sizes) handling are
    # host-side Python state, not kernel work.
    print("KERNEL_OK")
</pallas_src>

<mosaic_0001>
module attributes {stable_mosaic.version = 11 : i64} {
  func.func @lstm_tile_kernel(%arg0: i32, %arg1: memref<16x32xf32, #tpu.memory_space<vmem>>, %arg2: memref<1x128xf32, #tpu.memory_space<vmem>>, %arg3: memref<32x128xf32, #tpu.memory_space<any>>, %arg4: memref<32x128xf32, #tpu.memory_space<any>>, %arg5: memref<16x32xf32, #tpu.memory_space<vmem>>, %arg6: memref<32x128xf32, #tpu.memory_space<vmem>>, %arg7: memref<32x128xf32, #tpu.memory_space<vmem>>, %arg8: memref<16x128xf32, #tpu.memory_space<vmem>>, %arg9: memref<2x32xf32, #tpu.memory_space<vmem>>, %arg10: memref<2x32xf32, #tpu.memory_space<vmem>>, %arg11: memref<2x!tpu.dma_semaphore, #tpu.memory_space<semaphore_mem>>) attributes {dimension_semantics = [#tpu.dimension_semantics<arbitrary>], iteration_bounds = array<i64: 1>, scalar_prefetch = 0 : i64, scratch_operands = 6 : i64, tpu.core_type = #tpu.core_type<tc>, window_params = [{transform_indices = @transform_0, window_bounds = array<i64: 16, 32>}, {pipeline_mode = #tpu.pipeline_mode<synchronous>, transform_indices = @transform_1, window_bounds = array<i64: 1, 128>}, {}, {}, {transform_indices = @transform_4, window_bounds = array<i64: 16, 32>}]} {
    %c0_i32 = arith.constant 0 : i32
    %0 = arith.cmpi eq, %arg0, %c0_i32 : i32
    %1 = arith.extui %0 : i1 to i32
    %c0_i32_0 = arith.constant 0 : i32
    %2 = arith.cmpi ne, %1, %c0_i32_0 : i32
    scf.if %2 {
      %c0_i32_101 = arith.constant 0 : i32
      %272 = tpu.memref_slice %arg11[%c0_i32_101] : memref<2x!tpu.dma_semaphore, #tpu.memory_space<semaphore_mem>> -> memref<1x!tpu.dma_semaphore, #tpu.memory_space<semaphore_mem>>
      %273 = tpu.memref_squeeze %272 : memref<1x!tpu.dma_semaphore, #tpu.memory_space<semaphore_mem>> -> memref<!tpu.dma_semaphore, #tpu.memory_space<semaphore_mem>>
      tpu.enqueue_dma source(%arg3 : memref<32x128xf32, #tpu.memory_space<any>>) target(%arg6 : memref<32x128xf32, #tpu.memory_space<vmem>>) target_semaphore(%273 : memref<!tpu.dma_semaphore, #tpu.memory_space<semaphore_mem>>)
      %c1_i32_102 = arith.constant 1 : i32
      %274 = tpu.memref_slice %arg11[%c1_i32_102] : memref<2x!tpu.dma_semaphore, #tpu.memory_space<semaphore_mem>> -> memref<1x!tpu.dma_semaphore, #tpu.memory_space<semaphore_mem>>
      %275 = tpu.memref_squeeze %274 : memref<1x!tpu.dma_semaphore, #tpu.memory_space<semaphore_mem>> -> memref<!tpu.dma_semaphore, #tpu.memory_space<semaphore_mem>>
      tpu.enqueue_dma source(%arg4 : memref<32x128xf32, #tpu.memory_space<any>>) target(%arg7 : memref<32x128xf32, #tpu.memory_space<vmem>>) target_semaphore(%275 : memref<!tpu.dma_semaphore, #tpu.memory_space<semaphore_mem>>)
      %c0_i32_103 = arith.constant 0 : i32
      %276 = tpu.memref_slice %arg11[%c0_i32_103] : memref<2x!tpu.dma_semaphore, #tpu.memory_space<semaphore_mem>> -> memref<1x!tpu.dma_semaphore, #tpu.memory_space<semaphore_mem>>
      %277 = tpu.memref_squeeze %276 : memref<1x!tpu.dma_semaphore, #tpu.memory_space<semaphore_mem>> -> memref<!tpu.dma_semaphore, #tpu.memory_space<semaphore_mem>>
      tpu.wait_dma2 semaphore(%277 : memref<!tpu.dma_semaphore, #tpu.memory_space<semaphore_mem>>) src(%arg3 : memref<32x128xf32, #tpu.memory_space<any>>) dst(%arg6 : memref<32x128xf32, #tpu.memory_space<vmem>>)
      %c1_i32_104 = arith.constant 1 : i32
      %278 = tpu.memref_slice %arg11[%c1_i32_104] : memref<2x!tpu.dma_semaphore, #tpu.memory_space<semaphore_mem>> -> memref<1x!tpu.dma_semaphore, #tpu.memory_space<semaphore_mem>>
      %279 = tpu.memref_squeeze %278 : memref<1x!tpu.dma_semaphore, #tpu.memory_space<semaphore_mem>> -> memref<!tpu.dma_semaphore, #tpu.memory_space<semaphore_mem>>
      tpu.wait_dma2 semaphore(%279 : memref<!tpu.dma_semaphore, #tpu.memory_space<semaphore_mem>>) src(%arg4 : memref<32x128xf32, #tpu.memory_space<any>>) dst(%arg7 : memref<32x128xf32, #tpu.memory_space<vmem>>)
      %cst_105 = arith.constant 0.000000e+00 : f32
      %280 = vector.broadcast %cst_105 : f32 to vector<2x32xf32>
      %c0_106 = arith.constant 0 : index
      %c0_107 = arith.constant 0 : index
      %281 = vector.load %arg9[%c0_106, %c0_107] : memref<2x32xf32, #tpu.memory_space<vmem>>, vector<2x32xf32>
      tpu.vector_store %arg9[%c0_106, %c0_107], %280 {strides = array<i32>} : memref<2x32xf32, #tpu.memory_space<vmem>>, vector<2x32xf32>,
      %cst_108 = arith.constant 0.000000e+00 : f32
      %282 = vector.broadcast %cst_108 : f32 to vector<2x32xf32>
      %c0_109 = arith.constant 0 : index
      %c0_110 = arith.constant 0 : index
      %283 = vector.load %arg10[%c0_109, %c0_110] : memref<2x32xf32, #tpu.memory_space<vmem>>, vector<2x32xf32>
      tpu.vector_store %arg10[%c0_109, %c0_110], %282 {strides = array<i32>} : memref<2x32xf32, #tpu.memory_space<vmem>>, vector<2x32xf32>,
    } else {
    }
    %c0 = arith.constant 0 : index
    %c0_1 = arith.constant 0 : index
    %3 = vector.load %arg1[%c0, %c0_1] : memref<16x32xf32, #tpu.memory_space<vmem>>, vector<16x32xf32>
    %c0_2 = arith.constant 0 : index
    %c0_3 = arith.constant 0 : index
    %4 = vector.load %arg6[%c0_2, %c0_3] : memref<32x128xf32, #tpu.memory_space<vmem>>, vector<32x128xf32>
    %cst = arith.constant dense<0.000000e+00> : vector<16x128xf32>
    %5 = tpu.matmul %3, %4, %cst {dimension_numbers = #tpu.dot_dimension_numbers<[1], [0], [0], [1], [0, 0, 1, 1], [], []>} : vector<16x32xf32>, vector<32x128xf32>, vector<16x128xf32> -> vector<16x128xf32>
    %c0_4 = arith.constant 0 : index
    %c0_5 = arith.constant 0 : index
    %6 = vector.load %arg2[%c0_4, %c0_5] : memref<1x128xf32, #tpu.memory_space<vmem>>, vector<1x128xf32>
    %7 = vector.broadcast %6 : vector<1x128xf32> to vector<16x128xf32>
    %8 = arith.addf %5, %7 : vector<16x128xf32>
    %c0_6 = arith.constant 0 : index
    %c0_7 = arith.constant 0 : index
    %9 = vector.load %arg8[%c0_6, %c0_7] : memref<16x128xf32, #tpu.memory_space<vmem>>, vector<16x128xf32>
    tpu.vector_store %arg8[%c0_6, %c0_7], %8 {strides = array<i32>} : memref<16x128xf32, #tpu.memory_space<vmem>>, vector<16x128xf32>,
    %c0_8 = arith.constant 0 : index
    %c0_9 = arith.constant 0 : index
    %10 = vector.load %arg7[%c0_8, %c0_9] : memref<32x128xf32, #tpu.memory_space<vmem>>, vector<32x128xf32>
    %11 = tpu.iota {dimensions = array<i32: 1>} : vector<2x128xi32>
    %c64_i32 = arith.constant 64 : i32
    %12 = vector.broadcast %c64_i32 : i32 to vector<2x128xi32>
    %13 = arith.cmpi sge, %11, %12 : vector<2x128xi32>
    %c96_i32 = arith.constant 96 : i32
    %14 = vector.broadcast %c96_i32 : i32 to vector<2x128xi32>
    %15 = arith.cmpi slt, %11, %14 : vector<2x128xi32>
    %16 = arith.andi %13, %15 : vector<2x128xi1>
    %cst_10 = arith.constant 1.000000e+00 : f32
    %cst_11 = arith.constant 5.000000e-01 : f32
    %17 = vector.broadcast %cst_10 : f32 to vector<2x128xf32>
    %18 = vector.broadcast %cst_11 : f32 to vector<2x128xf32>
    %19 = arith.select %16, %17, %18 : vector<2x128xi1>, vector<2x128xf32>
    %c0_12 = arith.constant 0 : index
    %c0_13 = arith.constant 0 : index
    %20 = vector.load %arg9[%c0_12, %c0_13] : memref<2x32xf32, #tpu.memory_space<vmem>>, vector<2x32xf32>
    %c0_14 = arith.constant 0 : index
    %c0_15 = arith.constant 0 : index
    %21 = vector.load %arg10[%c0_14, %c0_15] : memref<2x32xf32, #tpu.memory_space<vmem>>, vector<2x32xf32>
    %c0_i32_16 = arith.constant 0 : i32
    %c2_i32 = arith.constant 2 : i32
    %22 = arith.muli %c0_i32_16, %c2_i32 : i32
    %23 = tpu.assume_multiple %22, 2 : i32
    %24 = arith.index_cast %23 : i32 to index
    %c0_17 = arith.constant 0 : index
    %25 = vector.load %arg8[%24, %c0_17] : memref<16x128xf32, #tpu.memory_space<vmem>>, vector<2x128xf32>
    %cst_18 = arith.constant dense<0.000000e+00> : vector<2x128xf32>
    %26 = tpu.matmul %20, %10, %cst_18 {dimension_numbers = #tpu.dot_dimension_numbers<[1], [0], [0], [1], [0, 0, 1, 1], [], []>} : vector<2x32xf32>, vector<32x128xf32>, vector<2x128xf32> -> vector<2x128xf32>
    %27 = arith.addf %25, %26 : vector<2x128xf32>
    %28 = arith.mulf %27, %19 : vector<2x128xf32>
    %29 = math.tanh %28 : vector<2x128xf32>
    %30 = vector.extract_strided_slice %29 {offsets = [0, 0], sizes = [2, 32], strides = [1, 1]} : vector<2x128xf32> to vector<2x32xf32>
    %cst_19 = arith.constant 1.000000e+00 : f32
    %31 = vector.broadcast %cst_19 : f32 to vector<2x32xf32>
    %32 = arith.addf %31, %30 : vector<2x32xf32>
    %cst_20 = arith.constant 5.000000e-01 : f32
    %33 = vector.broadcast %cst_20 : f32 to vector<2x32xf32>
    %34 = arith.mulf %33, %32 : vector<2x32xf32>
    %35 = vector.extract_strided_slice %29 {offsets = [0, 32], sizes = [2, 32], strides = [1, 1]} : vector<2x128xf32> to vector<2x32xf32>
    %cst_21 = arith.constant 1.000000e+00 : f32
    %36 = vector.broadcast %cst_21 : f32 to vector<2x32xf32>
    %37 = arith.addf %36, %35 : vector<2x32xf32>
    %cst_22 = arith.constant 5.000000e-01 : f32
    %38 = vector.broadcast %cst_22 : f32 to vector<2x32xf32>
    %39 = arith.mulf %38, %37 : vector<2x32xf32>
    %40 = vector.extract_strided_slice %29 {offsets = [0, 64], sizes = [2, 32], strides = [1, 1]} : vector<2x128xf32> to vector<2x32xf32>
    %41 = vector.extract_strided_slice %29 {offsets = [0, 96], sizes = [2, 32], strides = [1, 1]} : vector<2x128xf32> to vector<2x32xf32>
    %cst_23 = arith.constant 1.000000e+00 : f32
    %42 = vector.broadcast %cst_23 : f32 to vector<2x32xf32>
    %43 = arith.addf %42, %41 : vector<2x32xf32>
    %cst_24 = arith.constant 5.000000e-01 : f32
    %44 = vector.broadcast %cst_24 : f32 to vector<2x32xf32>
    %45 = arith.mulf %44, %43 : vector<2x32xf32>
    %46 = arith.mulf %39, %21 : vector<2x32xf32>
    %47 = arith.mulf %34, %40 : vector<2x32xf32>
    %48 = arith.addf %46, %47 : vector<2x32xf32>
    %49 = math.tanh %48 : vector<2x32xf32>
    %50 = arith.mulf %45, %49 : vector<2x32xf32>
    %51 = arith.index_cast %23 : i32 to index
    %c0_25 = arith.constant 0 : index
    %52 = vector.load %arg5[%51, %c0_25] : memref<16x32xf32, #tpu.memory_space<vmem>>, vector<2x32xf32>
    tpu.vector_store %arg5[%51, %c0_25], %50 {strides = array<i32>} : memref<16x32xf32, #tpu.memory_space<vmem>>, vector<2x32xf32>,
    %c1_i32 = arith.constant 1 : i32
    %c2_i32_26 = arith.constant 2 : i32
    %53 = arith.muli %c1_i32, %c2_i32_26 : i32
    %54 = tpu.assume_multiple %53, 2 : i32
    %55 = arith.index_cast %54 : i32 to index
    %c0_27 = arith.constant 0 : index
    %56 = vector.load %arg8[%55, %c0_27] : memref<16x128xf32, #tpu.memory_space<vmem>>, vector<2x128xf32>
    %cst_28 = arith.constant dense<0.000000e+00> : vector<2x128xf32>
    %57 = tpu.matmul %50, %10, %cst_28 {dimension_numbers = #tpu.dot_dimension_numbers<[1], [0], [0], [1], [0, 0, 1, 1], [], []>} : vector<2x32xf32>, vector<32x128xf32>, vector<2x128xf32> -> vector<2x128xf32>
    %58 = arith.addf %56, %57 : vector<2x128xf32>
    %59 = arith.mulf %58, %19 : vector<2x128xf32>
    %60 = math.tanh %59 : vector<2x128xf32>
    %61 = vector.extract_strided_slice %60 {offsets = [0, 0], sizes = [2, 32], strides = [1, 1]} : vector<2x128xf32> to vector<2x32xf32>
    %cst_29 = arith.constant 1.000000e+00 : f32
    %62 = vector.broadcast %cst_29 : f32 to vector<2x32xf32>
    %63 = arith.addf %62, %61 : vector<2x32xf32>
    %cst_30 = arith.constant 5.000000e-01 : f32
    %64 = vector.broadcast %cst_30 : f32 to vector<2x32xf32>
    %65 = arith.mulf %64, %63 : vector<2x32xf32>
    %66 = vector.extract_strided_slice %60 {offsets = [0, 32], sizes = [2, 32], strides = [1, 1]} : vector<2x128xf32> to vector<2x32xf32>
    %cst_31 = arith.constant 1.000000e+00 : f32
    %67 = vector.broadcast %cst_31 : f32 to vector<2x32xf32>
    %68 = arith.addf %67, %66 : vector<2x32xf32>
    %cst_32 = arith.constant 5.000000e-01 : f32
    %69 = vector.broadcast %cst_32 : f32 to vector<2x32xf32>
    %70 = arith.mulf %69, %68 : vector<2x32xf32>
    %71 = vector.extract_strided_slice %60 {offsets = [0, 64], sizes = [2, 32], strides = [1, 1]} : vector<2x128xf32> to vector<2x32xf32>
    %72 = vector.extract_strided_slice %60 {offsets = [0, 96], sizes = [2, 32], strides = [1, 1]} : vector<2x128xf32> to vector<2x32xf32>
    %cst_33 = arith.constant 1.000000e+00 : f32
    %73 = vector.broadcast %cst_33 : f32 to vector<2x32xf32>
    %74 = arith.addf %73, %72 : vector<2x32xf32>
    %cst_34 = arith.constant 5.000000e-01 : f32
    %75 = vector.broadcast %cst_34 : f32 to vector<2x32xf32>
    %76 = arith.mulf %75, %74 : vector<2x32xf32>
    %77 = arith.mulf %70, %48 : vector<2x32xf32>
    %78 = arith.mulf %65, %71 : vector<2x32xf32>
    %79 = arith.addf %77, %78 : vector<2x32xf32>
    %80 = math.tanh %79 : vector<2x32xf32>
    %81 = arith.mulf %76, %80 : vector<2x32xf32>
    %82 = arith.index_cast %54 : i32 to index
    %c0_35 = arith.constant 0 : index
    %83 = vector.load %arg5[%82, %c0_35] : memref<16x32xf32, #tpu.memory_space<vmem>>, vector<2x32xf32>
    tpu.vector_store %arg5[%82, %c0_35], %81 {strides = array<i32>} : memref<16x32xf32, #tpu.memory_space<vmem>>, vector<2x32xf32>,
    %c2_i32_36 = arith.constant 2 : i32
    %c2_i32_37 = arith.constant 2 : i32
    %84 = arith.muli %c2_i32_36, %c2_i32_37 : i32
    %85 = tpu.assume_multiple %84, 2 : i32
    %86 = arith.index_cast %85 : i32 to index
    %c0_38 = arith.constant 0 : index
    %87 = vector.load %arg8[%86, %c0_38] : memref<16x128xf32, #tpu.memory_space<vmem>>, vector<2x128xf32>
    %cst_39 = arith.constant dense<0.000000e+00> : vector<2x128xf32>
    %88 = tpu.matmul %81, %10, %cst_39 {dimension_numbers = #tpu.dot_dimension_numbers<[1], [0], [0], [1], [0, 0, 1, 1], [], []>} : vector<2x32xf32>, vector<32x128xf32>, vector<2x128xf32> -> vector<2x128xf32>
    %89 = arith.addf %87, %88 : vector<2x128xf32>
    %90 = arith.mulf %89, %19 : vector<2x128xf32>
    %91 = math.tanh %90 : vector<2x128xf32>
    %92 = vector.extract_strided_slice %91 {offsets = [0, 0], sizes = [2, 32], strides = [1, 1]} : vector<2x128xf32> to vector<2x32xf32>
    %cst_40 = arith.constant 1.000000e+00 : f32
    %93 = vector.broadcast %cst_40 : f32 to vector<2x32xf32>
    %94 = arith.addf %93, %92 : vector<2x32xf32>
    %cst_41 = arith.constant 5.000000e-01 : f32
    %95 = vector.broadcast %cst_41 : f32 to vector<2x32xf32>
    %96 = arith.mulf %95, %94 : vector<2x32xf32>
    %97 = vector.extract_strided_slice %91 {offsets = [0, 32], sizes = [2, 32], strides = [1, 1]} : vector<2x128xf32> to vector<2x32xf32>
    %cst_42 = arith.constant 1.000000e+00 : f32
    %98 = vector.broadcast %cst_42 : f32 to vector<2x32xf32>
    %99 = arith.addf %98, %97 : vector<2x32xf32>
    %cst_43 = arith.constant 5.000000e-01 : f32
    %100 = vector.broadcast %cst_43 : f32 to vector<2x32xf32>
    %101 = arith.mulf %100, %99 : vector<2x32xf32>
    %102 = vector.extract_strided_slice %91 {offsets = [0, 64], sizes = [2, 32], strides = [1, 1]} : vector<2x128xf32> to vector<2x32xf32>
    %103 = vector.extract_strided_slice %91 {offsets = [0, 96], sizes = [2, 32], strides = [1, 1]} : vector<2x128xf32> to vector<2x32xf32>
    %cst_44 = arith.constant 1.000000e+00 : f32
    %104 = vector.broadcast %cst_44 : f32 to vector<2x32xf32>
    %105 = arith.addf %104, %103 : vector<2x32xf32>
    %cst_45 = arith.constant 5.000000e-01 : f32
    %106 = vector.broadcast %cst_45 : f32 to vector<2x32xf32>
    %107 = arith.mulf %106, %105 : vector<2x32xf32>
    %108 = arith.mulf %101, %79 : vector<2x32xf32>
    %109 = arith.mulf %96, %102 : vector<2x32xf32>
    %110 = arith.addf %108, %109 : vector<2x32xf32>
    %111 = math.tanh %110 : vector<2x32xf32>
    %112 = arith.mulf %107, %111 : vector<2x32xf32>
    %113 = arith.index_cast %85 : i32 to index
    %c0_46 = arith.constant 0 : index
    %114 = vector.load %arg5[%113, %c0_46] : memref<16x32xf32, #tpu.memory_space<vmem>>, vector<2x32xf32>
    tpu.vector_store %arg5[%113, %c0_46], %112 {strides = array<i32>} : memref<16x32xf32, #tpu.memory_space<vmem>>, vector<2x32xf32>,
    %c3_i32 = arith.constant 3 : i32
    %c2_i32_47 = arith.constant 2 : i32
    %115 = arith.muli %c3_i32, %c2_i32_47 : i32
    %116 = tpu.assume_multiple %115, 2 : i32
    %117 = arith.index_cast %116 : i32 to index
    %c0_48 = arith.constant 0 : index
    %118 = vector.load %arg8[%117, %c0_48] : memref<16x128xf32, #tpu.memory_space<vmem>>, vector<2x128xf32>
    %cst_49 = arith.constant dense<0.000000e+00> : vector<2x128xf32>
    %119 = tpu.matmul %112, %10, %cst_49 {dimension_numbers = #tpu.dot_dimension_numbers<[1], [0], [0], [1], [0, 0, 1, 1], [], []>} : vector<2x32xf32>, vector<32x128xf32>, vector<2x128xf32> -> vector<2x128xf32>
    %120 = arith.addf %118, %119 : vector<2x128xf32>
    %121 = arith.mulf %120, %19 : vector<2x128xf32>
    %122 = math.tanh %121 : vector<2x128xf32>
    %123 = vector.extract_strided_slice %122 {offsets = [0, 0], sizes = [2, 32], strides = [1, 1]} : vector<2x128xf32> to vector<2x32xf32>
    %cst_50 = arith.constant 1.000000e+00 : f32
    %124 = vector.broadcast %cst_50 : f32 to vector<2x32xf32>
    %125 = arith.addf %124, %123 : vector<2x32xf32>
    %cst_51 = arith.constant 5.000000e-01 : f32
    %126 = vector.broadcast %cst_51 : f32 to vector<2x32xf32>
    %127 = arith.mulf %126, %125 : vector<2x32xf32>
    %128 = vector.extract_strided_slice %122 {offsets = [0, 32], sizes = [2, 32], strides = [1, 1]} : vector<2x128xf32> to vector<2x32xf32>
    %cst_52 = arith.constant 1.000000e+00 : f32
    %129 = vector.broadcast %cst_52 : f32 to vector<2x32xf32>
    %130 = arith.addf %129, %128 : vector<2x32xf32>
    %cst_53 = arith.constant 5.000000e-01 : f32
    %131 = vector.broadcast %cst_53 : f32 to vector<2x32xf32>
    %132 = arith.mulf %131, %130 : vector<2x32xf32>
    %133 = vector.extract_strided_slice %122 {offsets = [0, 64], sizes = [2, 32], strides = [1, 1]} : vector<2x128xf32> to vector<2x32xf32>
    %134 = vector.extract_strided_slice %122 {offsets = [0, 96], sizes = [2, 32], strides = [1, 1]} : vector<2x128xf32> to vector<2x32xf32>
    %cst_54 = arith.constant 1.000000e+00 : f32
    %135 = vector.broadcast %cst_54 : f32 to vector<2x32xf32>
    %136 = arith.addf %135, %134 : vector<2x32xf32>
    %cst_55 = arith.constant 5.000000e-01 : f32
    %137 = vector.broadcast %cst_55 : f32 to vector<2x32xf32>
    %138 = arith.mulf %137, %136 : vector<2x32xf32>
    %139 = arith.mulf %132, %110 : vector<2x32xf32>
    %140 = arith.mulf %127, %133 : vector<2x32xf32>
    %141 = arith.addf %139, %140 : vector<2x32xf32>
    %142 = math.tanh %141 : vector<2x32xf32>
    %143 = arith.mulf %138, %142 : vector<2x32xf32>
    %144 = arith.index_cast %116 : i32 to index
    %c0_56 = arith.constant 0 : index
    %145 = vector.load %arg5[%144, %c0_56] : memref<16x32xf32, #tpu.memory_space<vmem>>, vector<2x32xf32>
    tpu.vector_store %arg5[%144, %c0_56], %143 {strides = array<i32>} : memref<16x32xf32, #tpu.memory_space<vmem>>, vector<2x32xf32>,
    %c4_i32 = arith.constant 4 : i32
    %c2_i32_57 = arith.constant 2 : i32
    %146 = arith.muli %c4_i32, %c2_i32_57 : i32
    %147 = tpu.assume_multiple %146, 2 : i32
    %148 = arith.index_cast %147 : i32 to index
    %c0_58 = arith.constant 0 : index
    %149 = vector.load %arg8[%148, %c0_58] : memref<16x128xf32, #tpu.memory_space<vmem>>, vector<2x128xf32>
    %cst_59 = arith.constant dense<0.000000e+00> : vector<2x128xf32>
    %150 = tpu.matmul %143, %10, %cst_59 {dimension_numbers = #tpu.dot_dimension_numbers<[1], [0], [0], [1], [0, 0, 1, 1], [], []>} : vector<2x32xf32>, vector<32x128xf32>, vector<2x128xf32> -> vector<2x128xf32>
    %151 = arith.addf %149, %150 : vector<2x128xf32>
    %152 = arith.mulf %151, %19 : vector<2x128xf32>
    %153 = math.tanh %152 : vector<2x128xf32>
    %154 = vector.extract_strided_slice %153 {offsets = [0, 0], sizes = [2, 32], strides = [1, 1]} : vector<2x128xf32> to vector<2x32xf32>
    %cst_60 = arith.constant 1.000000e+00 : f32
    %155 = vector.broadcast %cst_60 : f32 to vector<2x32xf32>
    %156 = arith.addf %155, %154 : vector<2x32xf32>
    %cst_61 = arith.constant 5.000000e-01 : f32
    %157 = vector.broadcast %cst_61 : f32 to vector<2x32xf32>
    %158 = arith.mulf %157, %156 : vector<2x32xf32>
    %159 = vector.extract_strided_slice %153 {offsets = [0, 32], sizes = [2, 32], strides = [1, 1]} : vector<2x128xf32> to vector<2x32xf32>
    %cst_62 = arith.constant 1.000000e+00 : f32
    %160 = vector.broadcast %cst_62 : f32 to vector<2x32xf32>
    %161 = arith.addf %160, %159 : vector<2x32xf32>
    %cst_63 = arith.constant 5.000000e-01 : f32
    %162 = vector.broadcast %cst_63 : f32 to vector<2x32xf32>
    %163 = arith.mulf %162, %161 : vector<2x32xf32>
    %164 = vector.extract_strided_slice %153 {offsets = [0, 64], sizes = [2, 32], strides = [1, 1]} : vector<2x128xf32> to vector<2x32xf32>
    %165 = vector.extract_strided_slice %153 {offsets = [0, 96], sizes = [2, 32], strides = [1, 1]} : vector<2x128xf32> to vector<2x32xf32>
    %cst_64 = arith.constant 1.000000e+00 : f32
    %166 = vector.broadcast %cst_64 : f32 to vector<2x32xf32>
    %167 = arith.addf %166, %165 : vector<2x32xf32>
    %cst_65 = arith.constant 5.000000e-01 : f32
    %168 = vector.broadcast %cst_65 : f32 to vector<2x32xf32>
    %169 = arith.mulf %168, %167 : vector<2x32xf32>
    %170 = arith.mulf %163, %141 : vector<2x32xf32>
    %171 = arith.mulf %158, %164 : vector<2x32xf32>
    %172 = arith.addf %170, %171 : vector<2x32xf32>
    %173 = math.tanh %172 : vector<2x32xf32>
    %174 = arith.mulf %169, %173 : vector<2x32xf32>
    %175 = arith.index_cast %147 : i32 to index
    %c0_66 = arith.constant 0 : index
    %176 = vector.load %arg5[%175, %c0_66] : memref<16x32xf32, #tpu.memory_space<vmem>>, vector<2x32xf32>
    tpu.vector_store %arg5[%175, %c0_66], %174 {strides = array<i32>} : memref<16x32xf32, #tpu.memory_space<vmem>>, vector<2x32xf32>,
    %c5_i32 = arith.constant 5 : i32
    %c2_i32_67 = arith.constant 2 : i32
    %177 = arith.muli %c5_i32, %c2_i32_67 : i32
    %178 = tpu.assume_multiple %177, 2 : i32
    %179 = arith.index_cast %178 : i32 to index
    %c0_68 = arith.constant 0 : index
    %180 = vector.load %arg8[%179, %c0_68] : memref<16x128xf32, #tpu.memory_space<vmem>>, vector<2x128xf32>
    %cst_69 = arith.constant dense<0.000000e+00> : vector<2x128xf32>
    %181 = tpu.matmul %174, %10, %cst_69 {dimension_numbers = #tpu.dot_dimension_numbers<[1], [0], [0], [1], [0, 0, 1, 1], [], []>} : vector<2x32xf32>, vector<32x128xf32>, vector<2x128xf32> -> vector<2x128xf32>
    %182 = arith.addf %180, %181 : vector<2x128xf32>
    %183 = arith.mulf %182, %19 : vector<2x128xf32>
    %184 = math.tanh %183 : vector<2x128xf32>
    %185 = vector.extract_strided_slice %184 {offsets = [0, 0], sizes = [2, 32], strides = [1, 1]} : vector<2x128xf32> to vector<2x32xf32>
    %cst_70 = arith.constant 1.000000e+00 : f32
    %186 = vector.broadcast %cst_70 : f32 to vector<2x32xf32>
    %187 = arith.addf %186, %185 : vector<2x32xf32>
    %cst_71 = arith.constant 5.000000e-01 : f32
    %188 = vector.broadcast %cst_71 : f32 to vector<2x32xf32>
    %189 = arith.mulf %188, %187 : vector<2x32xf32>
    %190 = vector.extract_strided_slice %184 {offsets = [0, 32], sizes = [2, 32], strides = [1, 1]} : vector<2x128xf32> to vector<2x32xf32>
    %cst_72 = arith.constant 1.000000e+00 : f32
    %191 = vector.broadcast %cst_72 : f32 to vector<2x32xf32>
    %192 = arith.addf %191, %190 : vector<2x32xf32>
    %cst_73 = arith.constant 5.000000e-01 : f32
    %193 = vector.broadcast %cst_73 : f32 to vector<2x32xf32>
    %194 = arith.mulf %193, %192 : vector<2x32xf32>
    %195 = vector.extract_strided_slice %184 {offsets = [0, 64], sizes = [2, 32], strides = [1, 1]} : vector<2x128xf32> to vector<2x32xf32>
    %196 = vector.extract_strided_slice %184 {offsets = [0, 96], sizes = [2, 32], strides = [1, 1]} : vector<2x128xf32> to vector<2x32xf32>
    %cst_74 = arith.constant 1.000000e+00 : f32
    %197 = vector.broadcast %cst_74 : f32 to vector<2x32xf32>
    %198 = arith.addf %197, %196 : vector<2x32xf32>
    %cst_75 = arith.constant 5.000000e-01 : f32
    %199 = vector.broadcast %cst_75 : f32 to vector<2x32xf32>
    %200 = arith.mulf %199, %198 : vector<2x32xf32>
    %201 = arith.mulf %194, %172 : vector<2x32xf32>
    %202 = arith.mulf %189, %195 : vector<2x32xf32>
    %203 = arith.addf %201, %202 : vector<2x32xf32>
    %204 = math.tanh %203 : vector<2x32xf32>
    %205 = arith.mulf %200, %204 : vector<2x32xf32>
    %206 = arith.index_cast %178 : i32 to index
    %c0_76 = arith.constant 0 : index
    %207 = vector.load %arg5[%206, %c0_76] : memref<16x32xf32, #tpu.memory_space<vmem>>, vector<2x32xf32>
    tpu.vector_store %arg5[%206, %c0_76], %205 {strides = array<i32>} : memref<16x32xf32, #tpu.memory_space<vmem>>, vector<2x32xf32>,
    %c6_i32 = arith.constant 6 : i32
    %c2_i32_77 = arith.constant 2 : i32
    %208 = arith.muli %c6_i32, %c2_i32_77 : i32
    %209 = tpu.assume_multiple %208, 2 : i32
    %210 = arith.index_cast %209 : i32 to index
    %c0_78 = arith.constant 0 : index
    %211 = vector.load %arg8[%210, %c0_78] : memref<16x128xf32, #tpu.memory_space<vmem>>, vector<2x128xf32>
    %cst_79 = arith.constant dense<0.000000e+00> : vector<2x128xf32>
    %212 = tpu.matmul %205, %10, %cst_79 {dimension_numbers = #tpu.dot_dimension_numbers<[1], [0], [0], [1], [0, 0, 1, 1], [], []>} : vector<2x32xf32>, vector<32x128xf32>, vector<2x128xf32> -> vector<2x128xf32>
    %213 = arith.addf %211, %212 : vector<2x128xf32>
    %214 = arith.mulf %213, %19 : vector<2x128xf32>
    %215 = math.tanh %214 : vector<2x128xf32>
    %216 = vector.extract_strided_slice %215 {offsets = [0, 0], sizes = [2, 32], strides = [1, 1]} : vector<2x128xf32> to vector<2x32xf32>
    %cst_80 = arith.constant 1.000000e+00 : f32
    %217 = vector.broadcast %cst_80 : f32 to vector<2x32xf32>
    %218 = arith.addf %217, %216 : vector<2x32xf32>
    %cst_81 = arith.constant 5.000000e-01 : f32
    %219 = vector.broadcast %cst_81 : f32 to vector<2x32xf32>
    %220 = arith.mulf %219, %218 : vector<2x32xf32>
    %221 = vector.extract_strided_slice %215 {offsets = [0, 32], sizes = [2, 32], strides = [1, 1]} : vector<2x128xf32> to vector<2x32xf32>
    %cst_82 = arith.constant 1.000000e+00 : f32
    %222 = vector.broadcast %cst_82 : f32 to vector<2x32xf32>
    %223 = arith.addf %222, %221 : vector<2x32xf32>
    %cst_83 = arith.constant 5.000000e-01 : f32
    %224 = vector.broadcast %cst_83 : f32 to vector<2x32xf32>
    %225 = arith.mulf %224, %223 : vector<2x32xf32>
    %226 = vector.extract_strided_slice %215 {offsets = [0, 64], sizes = [2, 32], strides = [1, 1]} : vector<2x128xf32> to vector<2x32xf32>
    %227 = vector.extract_strided_slice %215 {offsets = [0, 96], sizes = [2, 32], strides = [1, 1]} : vector<2x128xf32> to vector<2x32xf32>
    %cst_84 = arith.constant 1.000000e+00 : f32
    %228 = vector.broadcast %cst_84 : f32 to vector<2x32xf32>
    %229 = arith.addf %228, %227 : vector<2x32xf32>
    %cst_85 = arith.constant 5.000000e-01 : f32
    %230 = vector.broadcast %cst_85 : f32 to vector<2x32xf32>
    %231 = arith.mulf %230, %229 : vector<2x32xf32>
    %232 = arith.mulf %225, %203 : vector<2x32xf32>
    %233 = arith.mulf %220, %226 : vector<2x32xf32>
    %234 = arith.addf %232, %233 : vector<2x32xf32>
    %235 = math.tanh %234 : vector<2x32xf32>
    %236 = arith.mulf %231, %235 : vector<2x32xf32>
    %237 = arith.index_cast %209 : i32 to index
    %c0_86 = arith.constant 0 : index
    %238 = vector.load %arg5[%237, %c0_86] : memref<16x32xf32, #tpu.memory_space<vmem>>, vector<2x32xf32>
    tpu.vector_store %arg5[%237, %c0_86], %236 {strides = array<i32>} : memref<16x32xf32, #tpu.memory_space<vmem>>, vector<2x32xf32>,
    %c7_i32 = arith.constant 7 : i32
    %c2_i32_87 = arith.constant 2 : i32
    %239 = arith.muli %c7_i32, %c2_i32_87 : i32
    %240 = tpu.assume_multiple %239, 2 : i32
    %241 = arith.index_cast %240 : i32 to index
    %c0_88 = arith.constant 0 : index
    %242 = vector.load %arg8[%241, %c0_88] : memref<16x128xf32, #tpu.memory_space<vmem>>, vector<2x128xf32>
    %cst_89 = arith.constant dense<0.000000e+00> : vector<2x128xf32>
    %243 = tpu.matmul %236, %10, %cst_89 {dimension_numbers = #tpu.dot_dimension_numbers<[1], [0], [0], [1], [0, 0, 1, 1], [], []>} : vector<2x32xf32>, vector<32x128xf32>, vector<2x128xf32> -> vector<2x128xf32>
    %244 = arith.addf %242, %243 : vector<2x128xf32>
    %245 = arith.mulf %244, %19 : vector<2x128xf32>
    %246 = math.tanh %245 : vector<2x128xf32>
    %247 = vector.extract_strided_slice %246 {offsets = [0, 0], sizes = [2, 32], strides = [1, 1]} : vector<2x128xf32> to vector<2x32xf32>
    %cst_90 = arith.constant 1.000000e+00 : f32
    %248 = vector.broadcast %cst_90 : f32 to vector<2x32xf32>
    %249 = arith.addf %248, %247 : vector<2x32xf32>
    %cst_91 = arith.constant 5.000000e-01 : f32
    %250 = vector.broadcast %cst_91 : f32 to vector<2x32xf32>
    %251 = arith.mulf %250, %249 : vector<2x32xf32>
    %252 = vector.extract_strided_slice %246 {offsets = [0, 32], sizes = [2, 32], strides = [1, 1]} : vector<2x128xf32> to vector<2x32xf32>
    %cst_92 = arith.constant 1.000000e+00 : f32
    %253 = vector.broadcast %cst_92 : f32 to vector<2x32xf32>
    %254 = arith.addf %253, %252 : vector<2x32xf32>
    %cst_93 = arith.constant 5.000000e-01 : f32
    %255 = vector.broadcast %cst_93 : f32 to vector<2x32xf32>
    %256 = arith.mulf %255, %254 : vector<2x32xf32>
    %257 = vector.extract_strided_slice %246 {offsets = [0, 64], sizes = [2, 32], strides = [1, 1]} : vector<2x128xf32> to vector<2x32xf32>
    %258 = vector.extract_strided_slice %246 {offsets = [0, 96], sizes = [2, 32], strides = [1, 1]} : vector<2x128xf32> to vector<2x32xf32>
    %cst_94 = arith.constant 1.000000e+00 : f32
    %259 = vector.broadcast %cst_94 : f32 to vector<2x32xf32>
    %260 = arith.addf %259, %258 : vector<2x32xf32>
    %cst_95 = arith.constant 5.000000e-01 : f32
    %261 = vector.broadcast %cst_95 : f32 to vector<2x32xf32>
    %262 = arith.mulf %261, %260 : vector<2x32xf32>
    %263 = arith.mulf %256, %234 : vector<2x32xf32>
    %264 = arith.mulf %251, %257 : vector<2x32xf32>
    %265 = arith.addf %263, %264 : vector<2x32xf32>
    %266 = math.tanh %265 : vector<2x32xf32>
    %267 = arith.mulf %262, %266 : vector<2x32xf32>
    %268 = arith.index_cast %240 : i32 to index
    %c0_96 = arith.constant 0 : index
    %269 = vector.load %arg5[%268, %c0_96] : memref<16x32xf32, #tpu.memory_space<vmem>>, vector<2x32xf32>
    tpu.vector_store %arg5[%268, %c0_96], %267 {strides = array<i32>} : memref<16x32xf32, #tpu.memory_space<vmem>>, vector<2x32xf32>,
    %c8_i32 = arith.constant 8 : i32
    %c0_97 = arith.constant 0 : index
    %c0_98 = arith.constant 0 : index
    %270 = vector.load %arg9[%c0_97, %c0_98] : memref<2x32xf32, #tpu.memory_space<vmem>>, vector<2x32xf32>
    tpu.vector_store %arg9[%c0_97, %c0_98], %267 {strides = array<i32>} : memref<2x32xf32, #tpu.memory_space<vmem>>, vector<2x32xf32>,
    %c0_99 = arith.constant 0 : index
    %c0_100 = arith.constant 0 : index
    %271 = vector.load %arg10[%c0_99, %c0_100] : memref<2x32xf32, #tpu.memory_space<vmem>>, vector<2x32xf32>
    tpu.vector_store %arg10[%c0_99, %c0_100], %265 {strides = array<i32>} : memref<2x32xf32, #tpu.memory_space<vmem>>, vector<2x32xf32>,
    return
  }
  func.func @transform_0(%arg0: i32) -> (i32, i32) {
    %c0_i32 = arith.constant 0 : i32
    %c0_i32_0 = arith.constant 0 : i32
    return %arg0, %c0_i32 : i32, i32
  }
  func.func @transform_1(%arg0: i32) -> (i32, i32) {
    %c0_i32 = arith.constant 0 : i32
    %c0_i32_0 = arith.constant 0 : i32
    %c0_i32_1 = arith.constant 0 : i32
    return %c0_i32, %c0_i32_0 : i32, i32
  }
  func.func @transform_4(%arg0: i32) -> (i32, i32) {
    %c0_i32 = arith.constant 0 : i32
    %c0_i32_0 = arith.constant 0 : i32
    return %arg0, %c0_i32 : i32, i32
  }
}

</mosaic_0001>

<bundles_post_ra>
// kernel: tpu_custom_call.1
= control target key start
LH: loop header
LB: loop body
LE: loop exit
PB: predicated region body
PF: predicated region fallthrough
CT: control target
= control target key end

     0   :  { %9 = vsyncpa [#allocation9], 0  ;;  %s1531_s0 = inlined_call_operand.hbm [shape: f32[16,32], index: 0, kind: input, shape index: {}]   ;;  %s1532_s1 = inlined_call_operand.vmem [shape: f32[1,128], index: 1, kind: input, shape index: {}]   ;;  %s1533_s2 = inlined_call_operand.hbm [shape: f32[32,128], index: 2, kind: input, shape index: {}]   ;;  %s1534_s3 = inlined_call_operand.hbm [shape: f32[32,128], index: 3, kind: input, shape index: {}]   ;;  %s1535_s4 = inlined_call_operand.hbm [shape: f32[16,32], index: 4, kind: output, shape index: {}]  }
   0x1   :  { %10 = vsyncpa [#allocation10], 0  ;;  %s1318_s15 = smov [#allocation8]  }
   0x2   :  { %s16_s16 = sshll.u32 %s1318_s15, 4  ;;  %s17_s16 = int_to_ptr.vmem [resolvable:$true] %s16_s16 }
   0x3   :  { %s1238_s17 = scalar_lea.vmem %s17_s16, 256  ;;  %p1243_p1 = scmp.lt.s32.totalorder %s17_s16, %s17_s16 }
   0x4   :  { %p1239_p0 = scmp.ne.s32.totalorder %s17_s16, %s1238_s17  ;;  %p1244_p2 = scmp.lt.s32.totalorder %s1238_s17, %s1238_s17 }
   0x6   :  { %p1245_p3 = por %p1244_p2, %p1243_p1 }
   0x8   :  { %p1246_p4 = pnand %p1245_p3, %p1239_p0 }
   0xa   :  { %1249 = shalt.err (!%p1246_p4)
}
   0xb   :  { %s1319_s18 = smov 128   ;;  %s1320_s19 = smov 8  }
   0xc   :  { %22 = dma.hbm_to_vmem [thread:$0]  %s1531_s0, 256, %s17_s16, [#allocation9], %s1319_s18, %s1319_s18, %s1320_s19  }
   0xd   :  { %1310 = dma.done.wait [#allocation9], 256  }
   0xe   :  { %1311 = vsyncadd [#allocation9], 4294967040  ;;  %s1321_s22 = smov [#allocation2]   ;;  %s1322_s24 = smov [#allocation3]  }
   0xf   :  { %s39_s23 = sshll.u32 %s1321_s22, 4  ;;  %s51_s25 = sshll.u32 %s1322_s24, 4  ;;  %s40_s23 = int_to_ptr.vmem [resolvable:$true] %s39_s23  ;;  %s52_s25 = int_to_ptr.vmem [resolvable:$true] %s51_s25 }
  0x10   :  { %s1258_s26 = scalar_lea.vmem %s40_s23, 512  ;;  %p1263_p6 = scmp.lt.s32.totalorder %s40_s23, %s40_s23 }
  0x11   :  { %p1259_p5 = scmp.ne.s32.totalorder %s40_s23, %s1258_s26  ;;  %p1264_p7 = scmp.lt.s32.totalorder %s1258_s26, %s1258_s26 }
  0x13   :  { %p1265_p8 = por %p1264_p7, %p1263_p6 }
  0x15   :  { %p1266_p9 = pnand %p1265_p8, %p1259_p5 }
  0x17   :  { %1269 = shalt.err (!%p1266_p9)  }
  0x18   :  { %42 = dma.hbm_to_vmem [thread:$0]  %s1533_s2, 512, %s40_s23, [#allocation7] }
  0x19   :  { %s1278_s0 = scalar_lea.vmem %s52_s25, 512  ;;  %p1283_p11 = scmp.lt.s32.totalorder %s52_s25, %s52_s25 }
  0x1a   :  { %p1279_p10 = scmp.ne.s32.totalorder %s52_s25, %s1278_s0  ;;  %p1284_p12 = scmp.lt.s32.totalorder %s1278_s0, %s1278_s0 }
  0x1c   :  { %p1285_p13 = por %p1284_p12, %p1283_p11 }
  0x1e   :  { %p1286_p0 = pnand %p1285_p13, %p1279_p10 }
  0x20   :  { %1289 = shalt.err (!%p1286_p0)  }
  0x21   :  { %54 = dma.hbm_to_vmem [thread:$0]  %s1534_s3, 512, %s52_s25, [#allocation7 + $0x1] }
  0x22   :  { %1312 = dma.done.wait [#allocation7], 512 }
  0x23   :  { %1313 = vsyncadd [#allocation7], 4294966784 }
  0x24   :  { %1314 = dma.done.wait [#allocation7 + $0x1], 512 }
  0x25   :  { %1315 = vsyncadd [#allocation7 + $0x1], 4294966784  ;;  %vm60_vm0 = vcmask 254976   ;;  %v1323_v0 = vmov 0.0   ;;  %vm1324_vm1 = vmmov 0   ;;  %vm76_vm2 = vcmask 261120  }
  0x26   :  { %1098 = vmatprep.subr.mxu1 %v1323_v0  ;;  %1106 = vmatprep.mubr.msk.f32.mxu1 %vm1324_vm1, %v1323_v0  ;;  %61 = vst.msk [vmem:[#allocation5] sm:$0x3] %vm60_vm0, %v1323_v0  ;;  %62 = vst.msk [vmem:[#allocation6] sm:$0x3] %vm60_vm0, %v1323_v0  ;;  %v68_v1 = vld [vmem:[#allocation2 + $0x18] sm:$0xff]  ;;  %v67_v2 = vld [vmem:[#allocation2 + $0x10] sm:$0xff]  ;;  %v164_v13 = vlaneseq }
  0x27   :  { %1087 = vmatprep.subr.mxu0 %v68_v1  ;;  %v63_v3 = vld [vmem:[#allocation8] sm:$0xff]  ;;  %v66_v4 = vld [vmem:[#allocation2 + $0x8] sm:$0xff]  ;;  %v65_v7 = vld [vmem:[#allocation2] sm:$0xff]  ;;  %v1325_v21 = vmov 0.5   ;;  %s1327_s5 = smov 32   ;;  %s1328_s6 = smov 96  }
  0x28   :  { %1088 = vmatpush3.msra.mxu0 %v68_v1  ;;  %1095 = vmatprep.mubr.msk.f32.mxu0 %vm76_vm2, %v63_v3  ;;  %v1375_v5 = vld [vmem:[#allocation3 + $0x18] sm:$0xff]  ;;  %v1377_v6 = vld [vmem:[#allocation3 + $0x10] sm:$0xff]  ;;  %v1381_v8 = vld [vmem:[#allocation3 + $0x8] sm:$0xff]  ;;  %v165_v18 = vand.u32 127, %v164_v13  ;;  %s1329_s7 = smov [#allocation11]  }
  0x29   :  { %1089 = vmatprep.subr.mxu0 %v67_v2  ;;  %1099 = vmatpush3.msra.mxu1 %v1375_v5  ;;  %v64_v9 = vld [vmem:[#allocation8 + $0x8] sm:$0xff]  ;;  %s1003_s8 = sshll.u32 %s1329_s7, 4  ;;  %s1004_s8 = int_to_ptr.vmem [resolvable:$true] %s1003_s8 }
  0x2a   :  { %1090 = vmatpush3.msra.mxu0 %v67_v2  ;;  %1100 = vmatprep.subr.mxu1 %v1323_v0  ;;  %v1385_v10 = vld [vmem:[#allocation3] sm:$0xff]  ;;  %vm166_vm3 = vcmp.ge.s32.totalorder %v165_v18, 64  ;;  %vm167_vm4 = vcmp.lt.s32.totalorder %v165_v18, 96  ;;  %s1290_s9 = scalar_lea.vmem %s1004_s8, 256  ;;  %p1295_p2 = scmp.lt.s32.totalorder %s1004_s8, %s1004_s8 }
  0x2b   :  { %1091 = vmatprep.subr.mxu0 %v66_v4  ;;  %1101 = vmatpush3.msra.mxu1 %v1377_v6  ;;  %v1028_v12 = vld [vmem:[%s1532_s1] ss:$0 sm:$0xff]  ;;  %vm168_vm5 = vmand %vm166_vm3, %vm167_vm4  ;;  %s1326_s1 = smov 64   ;;  %p1291_p1 = scmp.ne.s32.totalorder %s1004_s8, %s1290_s9 }
  0x2c   :  { %1092 = vmatpush3.msra.mxu0 %v66_v4  ;;  %1102 = vmatprep.subr.mxu1 %v1323_v0  ;;  %v1417_v22 = vsel %vm168_vm5, 1.0, %v1325_v21  ;;  %p1296_p3 = scmp.lt.s32.totalorder %s1290_s9, %s1290_s9 }
  0x2d   :  { %1093 = vmatprep.subr.mxu0 %v65_v7  ;;  %1103 = vmatpush3.msra.mxu1 %v1381_v8  ;;  %v170_v11 = vld [vmem:[#allocation5] sm:$0x3]  ;;  %v171_v27 = vld [vmem:[#allocation6] sm:$0x3] }
  0x2e   :  { %1094 = vmatpush3.msra.mxu0 %v65_v7  ;;  %1104 = vmatprep.subr.mxu1 %v1323_v0  ;;  %p1297_p4 = por %p1296_p3, %p1295_p2 }
  0x2f   :  { %1096 = vmatmul.mubr.msk.f32.vlgmr.msra.gmra.mxu0 %vm76_vm2, %v64_v9  ;;  %1105 = vmatpush3.msra.mxu1 %v1385_v10 }
  0x30   :  { %1107 = vmatmul.mubr.msk.f32.vlgmr.msra.gmra.mxu1 %vm76_vm2, %v170_v11  ;;  %1109 = vmatprep.subr.mxu0 %v1323_v0  ;;  %p1298_p5 = pnand %p1297_p4, %p1291_p1 }
  0x31   :  { %1110 = vmatpush3.msra.mxu0 %v1375_v5  ;;  %1117 = vmatprep.mubr.msk.f32.mxu0 %vm1324_vm1, %v1323_v0 }
  0x32   :  { %1111 = vmatprep.subr.mxu0 %v1323_v0  ;;  %1120 = vmatprep.subr.mxu1 %v1323_v0 }
  0x33   :  { %1112 = vmatpush3.msra.mxu0 %v1377_v6  ;;  %1121 = vmatpush3.msra.mxu1 %v1375_v5 }
  0x34   :  { %1113 = vmatprep.subr.mxu0 %v1323_v0  ;;  %1122 = vmatprep.subr.mxu1 %v1323_v0 }
  0x35   :  { %1114 = vmatpush3.msra.mxu0 %v1381_v8  ;;  %1123 = vmatpush3.msra.mxu1 %v1377_v6 }
  0x36   :  { %1115 = vmatprep.subr.mxu0 %v1323_v0  ;;  %1124 = vmatprep.subr.mxu1 %v1323_v0 }
  0x37   :  { %1116 = vmatpush3.msra.mxu0 %v1385_v10  ;;  %1125 = vmatpush3.msra.mxu1 %v1381_v8 }
  0x38   :  { %1126 = vmatprep.subr.mxu1 %v1323_v0  ;;  %1128 = vmatprep.mubr.msk.f32.mxu1 %vm1324_vm1, %v1323_v0 }
  0x39   :  { %1127 = vmatpush3.msra.mxu1 %v1385_v10  ;;  %1131 = vmatprep.subr.mxu0 %v1323_v0 }
  0x3a   :  { %1142 = vmatprep.subr.mxu1 %v1323_v0 }
  0xef   :  { %v1097_v14 = vpop.f32.mrf.mxu0 }
  0xf0   :  { %v155_v15 = vadd.f32 %v1097_v14, %v1028_v12  ;;  %v242_v16 = vpop.f32.mrf.mxu1 }
  0xf1   :  { %v149_v17 = vpop.f32.mrf.mxu0 }
  0xf2   :  { %159 = vst [vmem:[#allocation4 + $0x8] sm:$0xff] %v155_v15  ;;  %v150_v19 = vadd.f32 %v1028_v12, %v149_v17  ;;  %v1108_v20 = vpop.f32.mrf.mxu1 }
  0xf4   :  { %158 = vst [vmem:[#allocation4] sm:$0xff] %v150_v19 }
  0xfb   :  { %v172_v23 = vld [vmem:[#allocation4] sm:$0x3]  ;;  %v279_v40 = vld [vmem:[#allocation4 + $0x2] sm:$0x3]  ;;  %v381_v57 = vld [vmem:[#allocation4 + $0x4] sm:$0x3] }
  0xfc   :  { %v246_v24 = vadd.f32 %v242_v16, %v172_v23  ;;  %v483_v15 = vld [vmem:[#allocation4 + $0x6] sm:$0x3] }
  0xfe   :  { %v247_v25 = vmul.f32 %v246_v24, %v1417_v22 }
 0x100   :  { %1198 = vtanh.f32 %v247_v25 }
 0x10d   :  { %v1199_v26 = vpop.eup %1198 }
 0x10e   :  { %257 = vrot.lane.b32.xlu0 %v1199_v26, %s1326_s1  ;;  %v249_v28 = vadd.f32 1.0, %v1199_v26 }
 0x110   :  { %v250_v29 = vmul.f32 0.5, %v249_v28 }
 0x112   :  { %252 = vrot.lane.b32.xlu0 %v171_v27, %s1327_s5 }
 0x180   :  { %v258_v30 = vpop.permute.xlu0 %257 }
 0x181   :  { %v260_v31 = vmul.f32 %v258_v30, %v250_v29 }
 0x183   :  { %262 = vrot.lane.b32.xlu1 %v260_v31, %s1327_s5 }
 0x184   :  { %v253_v32 = vpop.permute.xlu0 %252 }
 0x185   :  { %v255_v33 = vmul.f32 %v253_v32, %v250_v29 }
 0x1f5   :  { %v263_v34 = vpop.permute.xlu1 %262 }
 0x1f6   :  { %v265_v35 = vadd.f32 %v263_v34, %v255_v33  ;;  %v585_v33 = vld [vmem:[#allocation4 + $0x8] sm:$0x3] }
 0x1f8   :  { %1200 = vtanh.f32 %v265_v35 }
 0x205   :  { %v1201_v36 = vpop.eup %1200 }
 0x206   :  { %268 = vrot.lane.b32.xlu1 %v1201_v36, %s1326_s1 }
 0x278   :  { %v269_v37 = vpop.permute.xlu1 %268 }
 0x279   :  { %v271_v38 = vmul.f32 %v269_v37, %v250_v29 }
 0x27b   :  { %273 = vrot.lane.b32.xlu0 %v271_v38, %s1327_s5 }
 0x2ed   :  { %v274_v39 = vpop.permute.xlu0 %273 }
 0x2ee   :  { %277 = vst.msk [vmem:[#allocation11] sm:$0x3] %vm60_vm0, %v274_v39  ;;  %1118 = vmatmul.mubr.msk.f32.vlgmr.msra.gmra.mxu0 %vm76_vm2, %v274_v39 }
 0x2ef   :  { %1132 = vmatpush3.msra.mxu0 %v1375_v5  ;;  %1139 = vmatprep.mubr.msk.f32.mxu0 %vm1324_vm1, %v1323_v0 }
 0x2f0   :  { %1133 = vmatprep.subr.mxu0 %v1323_v0 }
 0x2f1   :  { %1134 = vmatpush3.msra.mxu0 %v1377_v6 }
 0x2f2   :  { %1135 = vmatprep.subr.mxu0 %v1323_v0 }
 0x2f3   :  { %1136 = vmatpush3.msra.mxu0 %v1381_v8 }
 0x2f4   :  { %1137 = vmatprep.subr.mxu0 %v1323_v0 }
 0x2f5   :  { %1138 = vmatpush3.msra.mxu0 %v1385_v10 }
 0x2f6   :  { %1153 = vmatprep.subr.mxu0 %v1323_v0 }
 0x3ae   :  { %v348_v41 = vpop.f32.mrf.mxu0 }
 0x3af   :  { %v352_v42 = vadd.f32 %v348_v41, %v279_v40 }
 0x3b0   :  { %v1119_v43 = vpop.f32.mrf.mxu0 }
 0x3b1   :  { %v353_v44 = vmul.f32 %v352_v42, %v1417_v22 }
 0x3b3   :  { %1202 = vtanh.f32 %v353_v44 }
 0x3c0   :  { %v1203_v45 = vpop.eup %1202 }
 0x3c1   :  { %359 = vrot.lane.b32.xlu1 %v1203_v45, %s1326_s1  ;;  %v355_v46 = vadd.f32 1.0, %v1203_v45 }
 0x3c3   :  { %v356_v47 = vmul.f32 0.5, %v355_v46 }
 0x3c5   :  { %v357_v50 = vmul.f32 %v356_v47, %v265_v35 }
 0x433   :  { %v360_v48 = vpop.permute.xlu1 %359 }
 0x434   :  { %v362_v49 = vmul.f32 %v360_v48, %v356_v47 }
 0x436   :  { %364 = vrot.lane.b32.xlu0 %v362_v49, %s1327_s5 }
 0x4a8   :  { %v365_v51 = vpop.permute.xlu0 %364 }
 0x4a9   :  { %v367_v52 = vadd.f32 %v365_v51, %v357_v50  ;;  %v687_v50 = vld [vmem:[#allocation4 + $0xa] sm:$0x3] }
 0x4ab   :  { %1204 = vtanh.f32 %v367_v52 }
 0x4b8   :  { %v1205_v53 = vpop.eup %1204 }
 0x4b9   :  { %370 = vrot.lane.b32.xlu1 %v1205_v53, %s1326_s1 }
 0x52b   :  { %v371_v54 = vpop.permute.xlu1 %370 }
 0x52c   :  { %v373_v55 = vmul.f32 %v371_v54, %v356_v47 }
 0x52e   :  { %375 = vrot.lane.b32.xlu0 %v373_v55, %s1327_s5 }
 0x5a0   :  { %v376_v56 = vpop.permute.xlu0 %375 }
 0x5a1   :  { %379 = vst.msk [vmem:[#allocation11 + $0x2] sm:$0x3] %vm60_vm0, %v376_v56  ;;  %1129 = vmatmul.mubr.msk.f32.vlgmr.msra.gmra.mxu1 %vm76_vm2, %v376_v56 }
 0x5a2   :  { %1143 = vmatpush3.msra.mxu1 %v1375_v5  ;;  %1150 = vmatprep.mubr.msk.f32.mxu1 %vm1324_vm1, %v1323_v0 }
 0x5a3   :  { %1144 = vmatprep.subr.mxu1 %v1323_v0 }
 0x5a4   :  { %1145 = vmatpush3.msra.mxu1 %v1377_v6 }
 0x5a5   :  { %1146 = vmatprep.subr.mxu1 %v1323_v0 }
 0x5a6   :  { %1147 = vmatpush3.msra.mxu1 %v1381_v8 }
 0x5a7   :  { %1148 = vmatprep.subr.mxu1 %v1323_v0 }
 0x5a8   :  { %1149 = vmatpush3.msra.mxu1 %v1385_v10 }
 0x5a9   :  { %1164 = vmatprep.subr.mxu1 %v1323_v0 }
 0x661   :  { %v450_v58 = vpop.f32.mrf.mxu1 }
 0x662   :  { %v454_v59 = vadd.f32 %v450_v58, %v381_v57 }
 0x663   :  { %v1130_v60 = vpop.f32.mrf.mxu1 }
 0x664   :  { %v455_v61 = vmul.f32 %v454_v59, %v1417_v22 }
 0x666   :  { %1206 = vtanh.f32 %v455_v61 }
 0x673   :  { %v1207_v62 = vpop.eup %1206 }
 0x674   :  { %461 = vrot.lane.b32.xlu1 %v1207_v62, %s1326_s1  ;;  %v457_v63 = vadd.f32 1.0, %v1207_v62  ;;  %v789_v62 = vld [vmem:[#allocation4 + $0xc] sm:$0x3] }
 0x676   :  { %v458_v1 = vmul.f32 0.5, %v457_v63 }
 0x678   :  { %v459_v4 = vmul.f32 %v458_v1, %v367_v52 }
 0x6e6   :  { %v462_v2 = vpop.permute.xlu1 %461 }
 0x6e7   :  { %v464_v3 = vmul.f32 %v462_v2, %v458_v1 }
 0x6e9   :  { %466 = vrot.lane.b32.xlu0 %v464_v3, %s1327_s5 }
 0x75b   :  { %v467_v7 = vpop.permute.xlu0 %466 }
 0x75c   :  { %v469_v9 = vadd.f32 %v467_v7, %v459_v4 }
 0x75e   :  { %1208 = vtanh.f32 %v469_v9 }
 0x76b   :  { %v1209_v11 = vpop.eup %1208 }
 0x76c   :  { %472 = vrot.lane.b32.xlu1 %v1209_v11, %s1326_s1 }
 0x7de   :  { %v473_v12 = vpop.permute.xlu1 %472 }
 0x7df   :  { %v475_v13 = vmul.f32 %v473_v12, %v458_v1 }
 0x7e1   :  { %477 = vrot.lane.b32.xlu0 %v475_v13, %s1327_s5 }
 0x853   :  { %v478_v14 = vpop.permute.xlu0 %477 }
 0x854   :  { %481 = vst.msk [vmem:[#allocation11 + $0x4] sm:$0x3] %vm60_vm0, %v478_v14  ;;  %1140 = vmatmul.mubr.msk.f32.vlgmr.msra.gmra.mxu0 %vm76_vm2, %v478_v14 }
 0x855   :  { %1154 = vmatpush3.msra.mxu0 %v1375_v5  ;;  %1161 = vmatprep.mubr.msk.f32.mxu0 %vm1324_vm1, %v1323_v0 }
 0x856   :  { %1155 = vmatprep.subr.mxu0 %v1323_v0 }
 0x857   :  { %1156 = vmatpush3.msra.mxu0 %v1377_v6 }
 0x858   :  { %1157 = vmatprep.subr.mxu0 %v1323_v0 }
 0x859   :  { %1158 = vmatpush3.msra.mxu0 %v1381_v8 }
 0x85a   :  { %1159 = vmatprep.subr.mxu0 %v1323_v0 }
 0x85b   :  { %1160 = vmatpush3.msra.mxu0 %v1385_v10 }
 0x85c   :  { %1175 = vmatprep.subr.mxu0 %v1323_v0 }
 0x914   :  { %v552_v16 = vpop.f32.mrf.mxu0 }
 0x915   :  { %v556_v17 = vadd.f32 %v552_v16, %v483_v15 }
 0x916   :  { %v1141_v18 = vpop.f32.mrf.mxu0 }
 0x917   :  { %v557_v19 = vmul.f32 %v556_v17, %v1417_v22 }
 0x919   :  { %1210 = vtanh.f32 %v557_v19 }
 0x926   :  { %v1211_v20 = vpop.eup %1210 }
 0x927   :  { %563 = vrot.lane.b32.xlu1 %v1211_v20, %s1326_s1  ;;  %v559_v21 = vadd.f32 1.0, %v1211_v20  ;;  %v891_v20 = vld [vmem:[#allocation4 + $0xe] sm:$0x3] }
 0x929   :  { %v560_v23 = vmul.f32 0.5, %v559_v21 }
 0x92b   :  { %v561_v26 = vmul.f32 %v560_v23, %v469_v9 }
 0x999   :  { %v564_v24 = vpop.permute.xlu1 %563 }
 0x99a   :  { %v566_v25 = vmul.f32 %v564_v24, %v560_v23 }
 0x99c   :  { %568 = vrot.lane.b32.xlu0 %v566_v25, %s1327_s5 }
 0xa0e   :  { %v569_v27 = vpop.permute.xlu0 %568 }
 0xa0f   :  { %v571_v28 = vadd.f32 %v569_v27, %v561_v26 }
 0xa11   :  { %1212 = vtanh.f32 %v571_v28 }
 0xa1e   :  { %v1213_v29 = vpop.eup %1212 }
 0xa1f   :  { %574 = vrot.lane.b32.xlu1 %v1213_v29, %s1326_s1 }
 0xa91   :  { %v575_v30 = vpop.permute.xlu1 %574 }
 0xa92   :  { %v577_v31 = vmul.f32 %v575_v30, %v560_v23 }
 0xa94   :  { %579 = vrot.lane.b32.xlu0 %v577_v31, %s1327_s5 }
 0xb06   :  { %v580_v32 = vpop.permute.xlu0 %579 }
 0xb07   :  { %583 = vst.msk [vmem:[#allocation11 + $0x6] sm:$0x3] %vm60_vm0, %v580_v32  ;;  %1151 = vmatmul.mubr.msk.f32.vlgmr.msra.gmra.mxu1 %vm76_vm2, %v580_v32 }
 0xb08   :  { %1165 = vmatpush3.msra.mxu1 %v1375_v5  ;;  %1172 = vmatprep.mubr.msk.f32.mxu1 %vm1324_vm1, %v1323_v0 }
 0xb09   :  { %1166 = vmatprep.subr.mxu1 %v1323_v0 }
 0xb0a   :  { %1167 = vmatpush3.msra.mxu1 %v1377_v6 }
 0xb0b   :  { %1168 = vmatprep.subr.mxu1 %v1323_v0 }
 0xb0c   :  { %1169 = vmatpush3.msra.mxu1 %v1381_v8 }
 0xb0d   :  { %1170 = vmatprep.subr.mxu1 %v1323_v0 }
 0xb0e   :  { %1171 = vmatpush3.msra.mxu1 %v1385_v10 }
 0xbc7   :  { %v654_v34 = vpop.f32.mrf.mxu1 }
 0xbc8   :  { %v658_v35 = vadd.f32 %v654_v34, %v585_v33 }
 0xbc9   :  { %v1152_v36 = vpop.f32.mrf.mxu1 }
 0xbca   :  { %v659_v37 = vmul.f32 %v658_v35, %v1417_v22 }
 0xbcc   :  { %1214 = vtanh.f32 %v659_v37 }
 0xbd9   :  { %v1215_v38 = vpop.eup %1214 }
 0xbda   :  { %665 = vrot.lane.b32.xlu1 %v1215_v38, %s1326_s1  ;;  %v661_v39 = vadd.f32 1.0, %v1215_v38 }
 0xbdc   :  { %v662_v40 = vmul.f32 0.5, %v661_v39 }
 0xbde   :  { %v663_v43 = vmul.f32 %v662_v40, %v571_v28 }
 0xc4c   :  { %v666_v41 = vpop.permute.xlu1 %665 }
 0xc4d   :  { %v668_v42 = vmul.f32 %v666_v41, %v662_v40 }
 0xc4f   :  { %670 = vrot.lane.b32.xlu0 %v668_v42, %s1327_s5 }
 0xcc1   :  { %v671_v44 = vpop.permute.xlu0 %670 }
 0xcc2   :  { %v673_v45 = vadd.f32 %v671_v44, %v663_v43 }
 0xcc4   :  { %1216 = vtanh.f32 %v673_v45 }
 0xcd1   :  { %v1217_v46 = vpop.eup %1216 }
 0xcd2   :  { %676 = vrot.lane.b32.xlu1 %v1217_v46, %s1326_s1 }
 0xd44   :  { %v677_v47 = vpop.permute.xlu1 %676 }
 0xd45   :  { %v679_v48 = vmul.f32 %v677_v47, %v662_v40 }
 0xd47   :  { %681 = vrot.lane.b32.xlu0 %v679_v48, %s1327_s5 }
 0xdb9   :  { %v682_v49 = vpop.permute.xlu0 %681 }
 0xdba   :  { %685 = vst.msk [vmem:[#allocation11 + $0x8] sm:$0x3] %vm60_vm0, %v682_v49  ;;  %1162 = vmatmul.mubr.msk.f32.vlgmr.msra.gmra.mxu0 %vm76_vm2, %v682_v49 }
 0xdbb   :  { %1176 = vmatpush3.msra.mxu0 %v1375_v5  ;;  %1183 = vmatprep.mubr.msk.f32.mxu0 %vm1324_vm1, %v1323_v0 }
 0xdbc   :  { %1177 = vmatprep.subr.mxu0 %v1323_v0 }
 0xdbd   :  { %1178 = vmatpush3.msra.mxu0 %v1377_v6 }
 0xdbe   :  { %1179 = vmatprep.subr.mxu0 %v1323_v0 }
 0xdbf   :  { %1180 = vmatpush3.msra.mxu0 %v1381_v8 }
 0xdc0   :  { %1181 = vmatprep.subr.mxu0 %v1323_v0 }
 0xdc1   :  { %1182 = vmatpush3.msra.mxu0 %v1385_v10 }
 0xe7a   :  { %v756_v51 = vpop.f32.mrf.mxu0 }
 0xe7b   :  { %v760_v52 = vadd.f32 %v756_v51, %v687_v50 }
 0xe7c   :  { %v1163_v53 = vpop.f32.mrf.mxu0 }
 0xe7d   :  { %v761_v5 = vmul.f32 %v760_v52, %v1417_v22 }
 0xe7f   :  { %1218 = vtanh.f32 %v761_v5 }
 0xe8c   :  { %v1219_v54 = vpop.eup %1218 }
 0xe8d   :  { %767 = vrot.lane.b32.xlu1 %v1219_v54, %s1326_s1  ;;  %v763_v55 = vadd.f32 1.0, %v1219_v54 }
 0xe8f   :  { %v764_v6 = vmul.f32 0.5, %v763_v55 }
 0xe91   :  { %v765_v8 = vmul.f32 %v764_v6, %v673_v45 }
 0xeff   :  { %v768_v56 = vpop.permute.xlu1 %767 }
 0xf00   :  { %v770_v57 = vmul.f32 %v768_v56, %v764_v6 }
 0xf02   :  { %772 = vrot.lane.b32.xlu0 %v770_v57, %s1327_s5 }
 0xf74   :  { %v773_v0 = vpop.permute.xlu0 %772 }
 0xf75   :  { %v775_v58 = vadd.f32 %v773_v0, %v765_v8 }
 0xf77   :  { %1220 = vtanh.f32 %v775_v58 }
 0xf84   :  { %v1221_v10 = vpop.eup %1220 }
 0xf85   :  { %778 = vrot.lane.b32.xlu1 %v1221_v10, %s1326_s1 }
 0xff7   :  { %v779_v59 = vpop.permute.xlu1 %778 }
 0xff8   :  { %v781_v60 = vmul.f32 %v779_v59, %v764_v6 }
 0xffa   :  { %783 = vrot.lane.b32.xlu0 %v781_v60, %s1327_s5 }
0x106c   :  { %v784_v61 = vpop.permute.xlu0 %783 }
0x106d   :  { %787 = vst.msk [vmem:[#allocation11 + $0xa] sm:$0x3] %vm60_vm0, %v784_v61  ;;  %1173 = vmatmul.mubr.msk.f32.vlgmr.msra.gmra.mxu1 %vm76_vm2, %v784_v61 }
0x112d   :  { %v858_v63 = vpop.f32.mrf.mxu1 }
0x112e   :  { %v862_v1 = vadd.f32 %v858_v63, %v789_v62 }
0x112f   :  { %v1174_v2 = vpop.f32.mrf.mxu1 }
0x1130   :  { %v863_v3 = vmul.f32 %v862_v1, %v1417_v22 }
0x1132   :  { %1222 = vtanh.f32 %v863_v3 }
0x113f   :  { %v1223_v4 = vpop.eup %1222 }
0x1140   :  { %869 = vrot.lane.b32.xlu1 %v1223_v4, %s1326_s1  ;;  %v865_v7 = vadd.f32 1.0, %v1223_v4 }
0x1142   :  { %v866_v9 = vmul.f32 0.5, %v865_v7 }
0x1144   :  { %v867_v13 = vmul.f32 %v866_v9, %v775_v58 }
0x11b2   :  { %v870_v11 = vpop.permute.xlu1 %869 }
0x11b3   :  { %v872_v12 = vmul.f32 %v870_v11, %v866_v9 }
0x11b5   :  { %874 = vrot.lane.b32.xlu0 %v872_v12, %s1327_s5 }
0x1227   :  { %v875_v14 = vpop.permute.xlu0 %874 }
0x1228   :  { %v877_v15 = vadd.f32 %v875_v14, %v867_v13 }
0x122a   :  { %1224 = vtanh.f32 %v877_v15 }
0x1237   :  { %v1225_v16 = vpop.eup %1224 }
0x1238   :  { %880 = vrot.lane.b32.xlu1 %v1225_v16, %s1326_s1 }
0x12aa   :  { %v881_v17 = vpop.permute.xlu1 %880 }
0x12ab   :  { %v883_v18 = vmul.f32 %v881_v17, %v866_v9 }
0x12ad   :  { %885 = vrot.lane.b32.xlu0 %v883_v18, %s1327_s5 }
0x131f   :  { %v886_v19 = vpop.permute.xlu0 %885 }
0x1320   :  { %889 = vst.msk [vmem:[#allocation11 + $0xc] sm:$0x3] %vm60_vm0, %v886_v19  ;;  %1184 = vmatmul.mubr.msk.f32.vlgmr.msra.gmra.mxu0 %vm76_vm2, %v886_v19 }
0x13e0   :  { %v960_v21 = vpop.f32.mrf.mxu0 }
0x13e1   :  { %v964_v23 = vadd.f32 %v960_v21, %v891_v20 }
0x13e2   :  { %v1185_v24 = vpop.f32.mrf.mxu0 }
0x13e3   :  { %v965_v25 = vmul.f32 %v964_v23, %v1417_v22 }
0x13e5   :  { %1226 = vtanh.f32 %v965_v25 }
0x13f2   :  { %v1227_v26 = vpop.eup %1226 }
0x13f3   :  { %971 = vrot.lane.b32.xlu1 %v1227_v26, %s1326_s1  ;;  %v967_v27 = vadd.f32 1.0, %v1227_v26 }
0x13f5   :  { %v968_v28 = vmul.f32 0.5, %v967_v27 }
0x13f7   :  { %v969_v31 = vmul.f32 %v968_v28, %v877_v15 }
0x1465   :  { %v972_v29 = vpop.permute.xlu1 %971 }
0x1466   :  { %v974_v30 = vmul.f32 %v972_v29, %v968_v28 }
0x1468   :  { %976 = vrot.lane.b32.xlu0 %v974_v30, %s1327_s5 }
0x14da   :  { %v977_v32 = vpop.permute.xlu0 %976 }
0x14db   :  { %v979_v33 = vadd.f32 %v977_v32, %v969_v31 }
0x14dd   :  { %1228 = vtanh.f32 %v979_v33 }
0x14ea   :  { %v1229_v34 = vpop.eup %1228 }
0x14eb   :  { %982 = vrot.lane.b32.xlu1 %v1229_v34, %s1326_s1 }
0x14ef   :  { %994 = vrot.lane.b32.xlu1 %v979_v33, %s1328_s6 }
0x155d   :  { %v983_v22 = vpop.permute.xlu1 %982 }
0x155e   :  { %v985_v35 = vmul.f32 %v983_v22, %v968_v28 }
0x1560   :  { %987 = vrot.lane.b32.xlu0 %v985_v35, %s1327_s5 }
0x1561   :  { %v995_v36 = vpop.permute.xlu1 %994 }
0x1562   :  { %997 = vst.msk [vmem:[#allocation6] sm:$0x3] %vm60_vm0, %v995_v36 }
0x15d2   :  { %v988_v37 = vpop.permute.xlu0 %987 }
0x15d3   :  { %991 = vst.msk [vmem:[#allocation11 + $0xe] sm:$0x3] %vm60_vm0, %v988_v37  ;;  %992 = vst.msk [vmem:[#allocation5] sm:$0x3] %vm60_vm0, %v988_v37 }
0x15d4   :  { %1301 = shalt.err (!%p1298_p5)
}
0x15d5   :  { %1009 = dma.vmem_to_hbm [thread:$0]  %s1004_s8, 256, %s1535_s4, [#allocation10], %s1319_s18, %s1319_s18, %s1320_s19  }
0x15d6   :  { %1316 = dma.done.wait [#allocation10], 256  }
0x15d7   :  { %1317 = vsyncadd [#allocation10], 4294967040 }
0x15d8   :  { %1013 = vsyncpa [#allocation9], 1 }
0x15d9   :  { %1014 = vsyncpa [#allocation10], 1 }
0x15da   :  { %1015 = vsyncmov [#allocation7] }
0x15dd   :  { %s1016_s12 = vpop.sfrf %1015 }
0x15de   :  { %p1039_p6 = scmp.ne.s32.totalorder %s1016_s12, 0 }
0x15e0   :  { %1020 = shalt.err (%p1039_p6)  }
0x15e1   :  { %1022 = vsyncmov [#allocation7 + $0x1] }
0x15e4   :  { %s1023_s13 = vpop.sfrf %1022 }
0x15e5   :  { %p1040_p7 = scmp.ne.s32.totalorder %s1023_s13, 0 }
0x15e7   :  { %1027 = shalt.err (%p1040_p7)  }

</bundles_post_ra>
